<compile_context>
chip_gen: v7x
topology: tpu7x:2x2x1
jax: 0.10.0
libtpu: 0.0.40
codegen_flags: <defaults>
</compile_context>

<pallas_src>
import functools
import numpy as np

import jax
import jax.numpy as jnp
from jax import lax
from jax.experimental import pallas as pl
from jax.experimental.pallas import tpu as pltpu


# ----------------------------------------------------------------------------
# Model configuration (constructor hyper-parameters, scaled down for the demo)
# ----------------------------------------------------------------------------
class CFG:
    num_cascades = 2          # default 12; scaled down for a small runnable demo
    sens_chans = 4            # default 8
    sens_pools = 2            # default 4
    chans = 8                 # default 18 (feature channels)
    pools = 2                 # default 4
    unet_chans = 32           # internal width of Unet2d feature processor
    mask_center = True
    kspace_mult_factor = 1.0e6
    crop_size = (450, 450)


IMAGE_CONV_CASCADES = [i for i in range(CFG.num_cascades) if i % 3 == 0]

_FEAT_DTYPE = jnp.bfloat16    # feature-space MXU inputs (f32 accumulation)
_CONV_TILE_H = 64             # target output-row tile for conv kernels
_ELEM_TILE_H = 128            # target row tile for elementwise/stat kernels


def _default_vmem_limit():
    """Generation-aware scoped-VMEM budget (~3/4 of physical)."""
    try:
        cap = pltpu.get_tpu_info().vmem_capacity_bytes
        return int(cap * 3 // 4)
    except Exception:
        return 64 * 1024 * 1024


_VMEM_LIMIT = _default_vmem_limit()


def _cparams(*sem):
    return pltpu.CompilerParams(dimension_semantics=sem,
                                vmem_limit_bytes=_VMEM_LIMIT)


def _row_tile(h, target):
    """Largest divisor of h that is a multiple of 8 and <= target, else h."""
    for d in range(min(h, target), 0, -1):
        if h % d == 0 and d % 8 == 0:
            return d
    return h


def _coil_groups(c):
    """Split the coil reduction into 2 partial sums (v7x megacore) if possible."""
    return 2 if (c % 2 == 0 and c >= 2) else 1


# ----------------------------------------------------------------------------
# In-kernel complex matmul helpers (Gauss 3-mult, invariant sums precomputed)
# ----------------------------------------------------------------------------
def _cmm_asum(ar, ai, asum, br, bi):
    """(ar+i*ai)@(br+i*bi) with asum = ar+ai precomputed (A grid-invariant)."""
    t1 = jnp.dot(ar, br, preferred_element_type=jnp.float32)
    t2 = jnp.dot(ai, bi, preferred_element_type=jnp.float32)
    t3 = jnp.dot(asum, br + bi, preferred_element_type=jnp.float32)
    return t1 - t2, t3 - t1 - t2


def _cmm_bsum(ar, ai, br, bi, bsum):
    """(ar+i*ai)@(br+i*bi) with bsum = br+bi precomputed (B grid-invariant)."""
    t1 = jnp.dot(ar, br, preferred_element_type=jnp.float32)
    t2 = jnp.dot(ai, bi, preferred_element_type=jnp.float32)
    t3 = jnp.dot(ar + ai, bsum, preferred_element_type=jnp.float32)
    return t1 - t2, t3 - t1 - t2


def _cdft2(xr, xi, hr, hi, hs, wtr, wti, wts):
    """Centered forward 2-D DFT:  (G_H @ X) @ G_W^T  (6 real matmuls)."""
    tr, ti = _cmm_asum(hr, hi, hs, xr, xi)
    return _cmm_bsum(tr, ti, wtr, wti, wts)


def _cdft2_flops(h, wd):
    return 6 * h * h * wd + 6 * h * wd * wd


# ----------------------------------------------------------------------------
# Pallas kernels
# ----------------------------------------------------------------------------
def _conv_kernel(w_ref, b_ref, valid_ref, x_ref, o_ref, s1_ref, s2_ref,
                 stage_ref, *, kh, kw, cin, tile_h, wp, want_stats):
    """Row-tiled conv GEMM: stage kh*kw shifted taps, one deep-K bf16 matmul.

    x_ref:     (cin, (tile_h + kh) * wp)   zero-padded tile, flat, +1 slack row
    w_ref:     (cout, kh*kw*cin)           bf16, tap-major columns
    stage_ref: (kh*kw*cin, tile_h*wp)      bf16 VMEM scratch
    o_ref:     (cout, tile_h*wp)           padded-width output (cols >= wd junk)
    s1/s2_ref: (cout, 1)                   per-tile masked sum / sumsq partials
    """
    lt = tile_h * wp
    for dy in range(kh):
        for dx in range(kw):
            s = dy * wp + dx
            base = (dy * kw + dx) * cin
            stage_ref[base:base + cin, :] = (
                x_ref[:, s:s + lt].astype(_FEAT_DTYPE))
    y = jnp.dot(w_ref[...], stage_ref[...],
                preferred_element_type=jnp.float32) + b_ref[...]
    o_ref[...] = y
    if want_stats:
        yv = y * valid_ref[...]
        s1_ref[...] = jnp.sum(yv, axis=1, keepdims=True)
        s2_ref[...] = jnp.sum(yv * yv, axis=1, keepdims=True)
    else:
        s1_ref[...] = jnp.zeros_like(s1_ref)
        s2_ref[...] = jnp.zeros_like(s2_ref)


def _scale_act_kernel(x_ref, m_ref, inv_ref, o_ref, *, act, neg_slope):
    """y = (x - mean) * inv  with optional fused LeakyReLU.  Row-tiled."""
    y = (x_ref[...] - m_ref[...]) * inv_ref[...]
    if act:
        y = jnp.where(y >= 0, y, neg_slope * y)
    o_ref[...] = y


def _stats_tile_kernel(x_ref, s1_ref, s2_ref):
    """Per-row-tile partial sum / sumsq per channel."""
    x = x_ref[...]                                        # (C, rt, W)
    s1_ref[...] = jnp.sum(jnp.sum(x, axis=2), axis=1, keepdims=True)
    s2_ref[...] = jnp.sum(jnp.sum(x * x, axis=2), axis=1, keepdims=True)


def _sens_norm_kernel(sr_ref, si_ref, or_ref, oi_ref):
    """Divide sensitivity maps by their RSS over the coil dimension."""
    sr, si = sr_ref[...], si_ref[...]                     # (c, rt, W)
    # TODO(synk): no epsilon, to match the torch reference exactly.
    r = jnp.sqrt(jnp.sum(sr * sr + si * si, axis=0, keepdims=True))
    or_ref[...] = sr / r
    oi_ref[...] = si / r


def _tconv_in_kernel(w_ref, x_ref, o_ref, *, cout, eps, neg_slope):
    """ConvTranspose2d(k=2,s=2,bias=False) + InstanceNorm + LeakyReLU.

    One (4*cout, cin)@(cin, L) bf16 GEMM; IN stats combined over the 4
    sub-position row groups (permutation invariant wrt the 2x2 interleave).
    """
    x = x_ref[...].astype(_FEAT_DTYPE)
    y = jnp.dot(w_ref[...], x, preferred_element_type=jnp.float32)  # (4*cout,L)
    ell = y.shape[1]
    rs1 = jnp.sum(y, axis=1, keepdims=True)               # (4*cout, 1)
    rs2 = jnp.sum(y * y, axis=1, keepdims=True)
    g1 = rs1[0:cout] + rs1[cout:2 * cout] + rs1[2 * cout:3 * cout] + rs1[3 * cout:]
    g2 = rs2[0:cout] + rs2[cout:2 * cout] + rs2[2 * cout:3 * cout] + rs2[3 * cout:]
    cnt = 4.0 * ell
    mean = g1 / cnt
    var = g2 / cnt - mean * mean
    inv = lax.rsqrt(var + eps)
    meanb = jnp.concatenate([mean, mean, mean, mean], axis=0)
    invb = jnp.concatenate([inv, inv, inv, inv], axis=0)
    z = (y - meanb) * invb
    o_ref[...] = jnp.where(z >= 0, z, neg_slope * z)


def _ifft_coil_kernel(keep_ref, kr_ref, ki_ref, hr_ref, hi_ref, hs_ref,
                      wtr_ref, wti_ref, wts_ref, or_ref, oi_ref):
    """Per-coil centered iFFT (conj trick) with fused low-frequency keep mask."""
    m = keep_ref[...]                                     # (1, W)
    dr = kr_ref[...] * m
    di = ki_ref[...] * m
    ur, ui = _cdft2(dr, -di, hr_ref[...], hi_ref[...], hs_ref[...],
                    wtr_ref[...], wti_ref[...], wts_ref[...])
    or_ref[...] = ur
    oi_ref[...] = -ui


def _ifft_reduce_kernel(kr_ref, ki_ref, sr_ref, si_ref, hr_ref, hi_ref, hs_ref,
                        wtr_ref, wti_ref, wts_ref, or_ref, oi_ref):
    """sens_reduce:  sum_c  ifft2c(k_c) * conj(s_c)   (coil axis = accumulator)."""
    @pl.when(pl.program_id(2) == 0)
    def _():
        or_ref[...] = jnp.zeros_like(or_ref)
        oi_ref[...] = jnp.zeros_like(oi_ref)

    ur, ui = _cdft2(kr_ref[...], -ki_ref[...], hr_ref[...], hi_ref[...],
                    hs_ref[...], wtr_ref[...], wti_ref[...], wts_ref[...])
    sr, si = sr_ref[...], si_ref[...]
    or_ref[...] += ur * sr - ui * si
    oi_ref[...] -= ui * sr + ur * si


def _dc_kernel(xr_ref, xi_ref, sr_ref, si_ref, kr_ref, ki_ref, m_ref,
               hr_ref, hi_ref, hs_ref, wtr_ref, wti_ref, wts_ref,
               or_ref, oi_ref):
    """Fused data-consistency:  sum_c conj(s_c)*ifft2c(mask*(fft2c(x*s_c)-k_c)).

    The inverse transform uses ifft2c = conj(fft2c(conj(.))) so only the
    forward DFT matrices are resident (the conjugations are folded into the
    subtraction / accumulation signs — zero extra VPU ops).
    """
    @pl.when(pl.program_id(2) == 0)
    def _():
        or_ref[...] = jnp.zeros_like(or_ref)
        oi_ref[...] = jnp.zeros_like(oi_ref)

    xr, xi = xr_ref[...], xi_ref[...]
    sr, si = sr_ref[...], si_ref[...]
    er = xr * sr - xi * si
    ei = xr * si + xi * sr
    pr, pi = _cdft2(er, ei, hr_ref[...], hi_ref[...], hs_ref[...],
                    wtr_ref[...], wti_ref[...], wts_ref[...])
    m = m_ref[...]                                        # (1, W)
    dr = (pr - kr_ref[...]) * m
    dic = (ki_ref[...] - pi) * m                          # = -Im of masked diff
    ur, ui = _cdft2(dr, dic, hr_ref[...], hi_ref[...], hs_ref[...],
                    wtr_ref[...], wti_ref[...], wts_ref[...])
    or_ref[...] += ur * sr - ui * si
    oi_ref[...] -= ui * sr + ur * si


def _decode_rss_kernel(xr_ref, xi_ref, sr_ref, si_ref, hr_ref, hi_ref, hs_ref,
                       wtr_ref, wti_ref, wts_ref, o_ref):
    """sum_c |ifft2c(fft2c(x*s_c))|^2 accumulated per coil group (sqrt in XLA)."""
    @pl.when(pl.program_id(2) == 0)
    def _():
        o_ref[...] = jnp.zeros_like(o_ref)

    xr, xi = xr_ref[...], xi_ref[...]
    sr, si = sr_ref[...], si_ref[...]
    er = xr * sr - xi * si
    ei = xr * si + xi * sr
    pr, pi = _cdft2(er, ei, hr_ref[...], hi_ref[...], hs_ref[...],
                    wtr_ref[...], wti_ref[...], wts_ref[...])
    ur, ui = _cdft2(pr, -pi, hr_ref[...], hi_ref[...], hs_ref[...],
                    wtr_ref[...], wti_ref[...], wts_ref[...])
    o_ref[...] += ur * ur + ui * ui


# ----------------------------------------------------------------------------
# Centered forward-DFT matrices (iFFT uses the conj identity -> no inverse mats)
# ----------------------------------------------------------------------------
_DFT_CACHE = {}


def _fwd_dft_mats(n):
    if n not in _DFT_CACHE:
        eye = np.fft.ifftshift(np.eye(n), axes=0)
        g = np.fft.fftshift(np.fft.fft(eye, axis=0, norm="ortho"), axes=0)
        gr = np.ascontiguousarray(g.real)
        gi = np.ascontiguousarray(g.imag)
        _DFT_CACHE[n] = tuple(
            jnp.asarray(a, jnp.float32)
            for a in (gr, gi, gr + gi,
                      np.ascontiguousarray(gr.T), np.ascontiguousarray(gi.T),
                      np.ascontiguousarray((gr + gi).T)))
    return _DFT_CACHE[n]


# ----------------------------------------------------------------------------
# Pallas wrappers
# ----------------------------------------------------------------------------
def _valid_cols(th, wd, wp):
    col = np.arange(th * wp, dtype=np.int64) % wp
    return jnp.asarray((col < wd).astype(np.float32)).reshape(1, th * wp)


def conv2d_fused(x, w, b=None, *, want_stats=False, h_tile=None):
    """'same' cross-correlation (PyTorch Conv2d, stride 1), row-tiled deep-K GEMM.

    Returns y (N, cout, H, W), plus per-channel masked (sum, sumsq) if
    want_stats (for the two-pass InstanceNorm epilogue).
    """
    n, cin, h, wd = x.shape
    cout, _, kh, kw = w.shape
    ph, pw = kh // 2, kw // 2
    wp = wd + 2 * pw
    th = _row_tile(h, _CONV_TILE_H if h_tile is None else h_tile)
    n_t = h // th
    lt = th * wp
    xin = (th + kh) * wp
    kdeep = kh * kw * cin

    xp = jnp.pad(x, ((0, 0), (0, 0), (ph, ph + 1), (pw, pw)))   # +1 slack row
    if n_t == 1:
        xt = xp.reshape(n, 1, cin, xin)
    else:
        xt = jnp.stack([xp[:, :, t * th:t * th + th + kh, :] for t in range(n_t)],
                       axis=1).reshape(n, n_t, cin, xin)

    wt = jnp.transpose(w, (0, 2, 3, 1)).reshape(cout, kdeep).astype(_FEAT_DTYPE)
    if b is None:
        b = jnp.zeros((cout,), jnp.float32)
    b2 = b.reshape(cout, 1)
    valid = _valid_cols(th, wd, wp)

    kern = functools.partial(_conv_kernel, kh=kh, kw=kw, cin=cin, tile_h=th,
                             wp=wp, want_stats=want_stats)
    flops = int(2 * n * cout * kdeep * h * wp)
    bytes_acc = int(4 * (xt.size + n * n_t * cout * lt) + 2 * wt.size)
    y, s1, s2 = pl.pallas_call(
        kern,
        out_shape=(jax.ShapeDtypeStruct((n, n_t, cout, lt), jnp.float32),
                   jax.ShapeDtypeStruct((n, n_t, cout, 1), jnp.float32),
                   jax.ShapeDtypeStruct((n, n_t, cout, 1), jnp.float32)),
        grid=(n, n_t),
        in_specs=[
            pl.BlockSpec((cout, kdeep), lambda i, t: (0, 0)),
            pl.BlockSpec((cout, 1), lambda i, t: (0, 0)),
            pl.BlockSpec((1, lt), lambda i, t: (0, 0)),
            pl.BlockSpec((None, None, cin, xin), lambda i, t: (i, t, 0, 0)),
        ],
        out_specs=(pl.BlockSpec((None, None, cout, lt), lambda i, t: (i, t, 0, 0)),
                   pl.BlockSpec((None, None, cout, 1), lambda i, t: (i, t, 0, 0)),
                   pl.BlockSpec((None, None, cout, 1), lambda i, t: (i, t, 0, 0))),
        scratch_shapes=[pltpu.VMEM((kdeep, lt), _FEAT_DTYPE)],
        compiler_params=_cparams("parallel", "parallel"),
        cost_estimate=pl.CostEstimate(flops=flops, transcendentals=0,
                                      bytes_accessed=bytes_acc),
    )(wt, b2, valid, xt)

    y = y.reshape(n, n_t, cout, th, wp)
    y = jnp.transpose(y, (0, 2, 1, 3, 4)).reshape(n, cout, h, wp)[..., :wd]
    if want_stats:
        return y, s1[..., 0].sum(axis=1), s2[..., 0].sum(axis=1)
    return y


def scale_act(x, mean, inv, *, act, neg_slope=0.2):
    """Row-tiled per-channel (x - mean) * inv with optional LeakyReLU."""
    n, c, h, wd = x.shape
    rt = _row_tile(h, _ELEM_TILE_H)
    n_t = h // rt
    kern = functools.partial(_scale_act_kernel, act=act, neg_slope=neg_slope)
    return pl.pallas_call(
        kern,
        out_shape=jax.ShapeDtypeStruct((n, c, h, wd), jnp.float32),
        grid=(n, n_t),
        in_specs=[pl.BlockSpec((None, c, rt, wd), lambda i, t: (i, 0, t, 0)),
                  pl.BlockSpec((None, c, 1, 1), lambda i, t: (i, 0, 0, 0)),
                  pl.BlockSpec((None, c, 1, 1), lambda i, t: (i, 0, 0, 0))],
        out_specs=pl.BlockSpec((None, c, rt, wd), lambda i, t: (i, 0, t, 0)),
        compiler_params=_cparams("parallel", "parallel"),
    )(x, mean, inv)


def channel_stats4(x):
    """x: (N, C, H, W) -> biased per-(N,C) mean / variance (each (N, C))."""
    n, c, h, wd = x.shape
    rt = _row_tile(h, _ELEM_TILE_H)
    n_t = h // rt
    s1, s2 = pl.pallas_call(
        _stats_tile_kernel,
        out_shape=(jax.ShapeDtypeStruct((n, n_t, c, 1), jnp.float32),) * 2,
        grid=(n, n_t),
        in_specs=[pl.BlockSpec((None, c, rt, wd), lambda i, t: (i, 0, t, 0))],
        out_specs=(pl.BlockSpec((None, None, c, 1), lambda i, t: (i, t, 0, 0)),
                   pl.BlockSpec((None, None, c, 1), lambda i, t: (i, t, 0, 0))),
        compiler_params=_cparams("parallel", "parallel"),
    )(x)
    cnt = float(h * wd)
    s1 = s1[..., 0].sum(axis=1)
    s2 = s2[..., 0].sum(axis=1)
    mean = s1 / cnt
    var = s2 / cnt - mean * mean
    return mean, var


def instance_norm(x, act=False, eps=1e-5, neg_slope=0.2):
    """InstanceNorm2d (affine=False), two-pass, with optional fused LeakyReLU."""
    n, c, h, wd = x.shape
    mean, var = channel_stats4(x)
    inv = lax.rsqrt(var + eps)
    return scale_act(x, mean.reshape(n, c, 1, 1), inv.reshape(n, c, 1, 1),
                     act=act, neg_slope=neg_slope)


def _apply_in_lrelu(y, s1, s2, eps=1e-5, neg_slope=0.2):
    """Finish the two-pass InstanceNorm from the conv kernel's partials."""
    n, c, h, wd = y.shape
    cnt = float(h * wd)
    mean = s1 / cnt
    var = s2 / cnt - mean * mean
    inv = lax.rsqrt(var + eps)
    return scale_act(y, mean.reshape(n, c, 1, 1), inv.reshape(n, c, 1, 1),
                     act=True, neg_slope=neg_slope)


def sens_normalize(sr, si):
    n, c, h, wd = sr.shape
    rt = _row_tile(h, _ELEM_TILE_H)
    n_t = h // rt
    spec = pl.BlockSpec((None, c, rt, wd), lambda i, t: (i, 0, t, 0))
    orr, oii = pl.pallas_call(
        _sens_norm_kernel,
        out_shape=(jax.ShapeDtypeStruct((n, c, h, wd), jnp.float32),) * 2,
        grid=(n, n_t),
        in_specs=[spec, spec],
        out_specs=(spec, spec),
        compiler_params=_cparams("parallel", "parallel"),
    )(sr, si)
    return orr, oii


def transpose_block_apply(p, x):
    """ConvTranspose2d(k=2, s=2, bias=False) + InstanceNorm + LeakyReLU(0.2)."""
    cout = p["w"].shape[1]
    wt = p["w"].reshape(4 * cout, -1).astype(_FEAT_DTYPE)   # (4*cout, cin)
    n, cin, h, wd = x.shape
    ell = h * wd
    out = pl.pallas_call(
        functools.partial(_tconv_in_kernel, cout=cout, eps=1e-5, neg_slope=0.2),
        out_shape=jax.ShapeDtypeStruct((n, 4 * cout, ell), jnp.float32),
        grid=(n,),
        in_specs=[pl.BlockSpec((4 * cout, cin), lambda i: (0, 0)),
                  pl.BlockSpec((None, cin, ell), lambda i: (i, 0, 0))],
        out_specs=pl.BlockSpec((None, 4 * cout, ell), lambda i: (i, 0, 0)),
        compiler_params=_cparams("parallel"),
    )(wt, x.reshape(n, cin, ell))
    out = out.reshape(n, 2, 2, cout, h, wd)
    out = jnp.transpose(out, (0, 3, 4, 1, 5, 2)).reshape(n, cout, 2 * h, 2 * wd)
    return out


def ifft2c_coils(kr, ki, keep):
    """Per-coil centered iFFT of (masked-center) k-space (conj trick)."""
    n, c, h, wd = kr.shape
    hr, hi, hs, _, _, _ = _fwd_dft_mats(h)
    _, _, _, wtr, wti, wts = _fwd_dft_mats(wd)
    coil = pl.BlockSpec((None, None, h, wd), lambda i, j: (i, j, 0, 0))
    mh = pl.BlockSpec((h, h), lambda i, j: (0, 0))
    mw = pl.BlockSpec((wd, wd), lambda i, j: (0, 0))
    flops = int(n * c * _cdft2_flops(h, wd))
    bytes_acc = int(4 * (4 * kr.size + keep.size))
    yr, yi = pl.pallas_call(
        _ifft_coil_kernel,
        out_shape=(jax.ShapeDtypeStruct((n, c, h, wd), jnp.float32),) * 2,
        grid=(n, c),
        in_specs=[pl.BlockSpec((None, 1, wd), lambda i, j: (i, 0, 0)),
                  coil, coil, mh, mh, mh, mw, mw, mw],
        out_specs=(coil, coil),
        compiler_params=_cparams("parallel", "parallel"),
        cost_estimate=pl.CostEstimate(flops=flops, transcendentals=0,
                                      bytes_accessed=bytes_acc),
    )(keep, kr, ki, hr, hi, hs, wtr, wti, wts)
    return yr, yi


def ifft_reduce(kr, ki, sr, si):
    """sens_reduce: sum_c ifft2c(k_c) * conj(s_c), coil-grouped for megacore."""
    n, c, h, wd = kr.shape
    g = _coil_groups(c)
    cg = c // g
    hr, hi, hs, _, _, _ = _fwd_dft_mats(h)
    _, _, _, wtr, wti, wts = _fwd_dft_mats(wd)
    coil = pl.BlockSpec((None, None, h, wd), lambda i, gg, j: (i, gg * cg + j, 0, 0))
    img_out = pl.BlockSpec((None, None, h, wd), lambda i, gg, j: (gg, i, 0, 0))
    mh = pl.BlockSpec((h, h), lambda i, gg, j: (0, 0))
    mw = pl.BlockSpec((wd, wd), lambda i, gg, j: (0, 0))
    flops = int(n * c * _cdft2_flops(h, wd))
    bytes_acc = int(4 * (4 * kr.size + 2 * g * n * h * wd))
    pr, pi = pl.pallas_call(
        _ifft_reduce_kernel,
        out_shape=(jax.ShapeDtypeStruct((g, n, h, wd), jnp.float32),) * 2,
        grid=(n, g, cg),
        in_specs=[coil, coil, coil, coil, mh, mh, mh, mw, mw, mw],
        out_specs=(img_out, img_out),
        compiler_params=_cparams("parallel", "parallel", "arbitrary"),
        cost_estimate=pl.CostEstimate(flops=flops, transcendentals=0,
                                      bytes_accessed=bytes_acc),
    )(kr, ki, sr, si, hr, hi, hs, wtr, wti, wts)
    return pr.sum(axis=0), pi.sum(axis=0)


def dc_chain(xr, xi, sr, si, kr, ki, maskf):
    """Fused DC image: sum_c conj(s_c) * ifft2c(mask*(fft2c(x*s_c) - k_c))."""
    n, c, h, wd = sr.shape
    g = _coil_groups(c)
    cg = c // g
    hr, hi, hs, _, _, _ = _fwd_dft_mats(h)
    _, _, _, wtr, wti, wts = _fwd_dft_mats(wd)
    coil = pl.BlockSpec((None, None, h, wd), lambda i, gg, j: (i, gg * cg + j, 0, 0))
    img_in = pl.BlockSpec((None, h, wd), lambda i, gg, j: (i, 0, 0))
    img_out = pl.BlockSpec((None, None, h, wd), lambda i, gg, j: (gg, i, 0, 0))
    msk = pl.BlockSpec((None, 1, wd), lambda i, gg, j: (i, 0, 0))
    mh = pl.BlockSpec((h, h), lambda i, gg, j: (0, 0))
    mw = pl.BlockSpec((wd, wd), lambda i, gg, j: (0, 0))
    flops = int(n * c * (2 * _cdft2_flops(h, wd) + 10 * h * wd))
    bytes_acc = int(4 * (2 * xr.size + 4 * sr.size + maskf.size
                         + 2 * g * n * h * wd))
    pr, pi = pl.pallas_call(
        _dc_kernel,
        out_shape=(jax.ShapeDtypeStruct((g, n, h, wd), jnp.float32),) * 2,
        grid=(n, g, cg),
        in_specs=[img_in, img_in, coil, coil, coil, coil, msk,
                  mh, mh, mh, mw, mw, mw],
        out_specs=(img_out, img_out),
        compiler_params=_cparams("parallel", "parallel", "arbitrary"),
        cost_estimate=pl.CostEstimate(flops=flops, transcendentals=0,
                                      bytes_accessed=bytes_acc),
    )(xr, xi, sr, si, kr, ki, maskf, hr, hi, hs, wtr, wti, wts)
    return pr.sum(axis=0), pi.sum(axis=0)


def decode_rss(xr, xi, sr, si):
    """Final output: rss over coils of |ifft2c(fft2c(x*s_c))| -> (N, H, W)."""
    n, c, h, wd = sr.shape
    g = _coil_groups(c)
    cg = c // g
    hr, hi, hs, _, _, _ = _fwd_dft_mats(h)
    _, _, _, wtr, wti, wts = _fwd_dft_mats(wd)
    coil = pl.BlockSpec((None, None, h, wd), lambda i, gg, j: (i, gg * cg + j, 0, 0))
    img_in = pl.BlockSpec((None, h, wd), lambda i, gg, j: (i, 0, 0))
    img_out = pl.BlockSpec((None, None, h, wd), lambda i, gg, j: (gg, i, 0, 0))
    mh = pl.BlockSpec((h, h), lambda i, gg, j: (0, 0))
    mw = pl.BlockSpec((wd, wd), lambda i, gg, j: (0, 0))
    flops = int(n * c * 2 * _cdft2_flops(h, wd))
    bytes_acc = int(4 * (2 * xr.size + 2 * sr.size + g * n * h * wd))
    part = pl.pallas_call(
        _decode_rss_kernel,
        out_shape=jax.ShapeDtypeStruct((g, n, h, wd), jnp.float32),
        grid=(n, g, cg),
        in_specs=[img_in, img_in, coil, coil, mh, mh, mh, mw, mw, mw],
        out_specs=img_out,
        compiler_params=_cparams("parallel", "parallel", "arbitrary"),
        cost_estimate=pl.CostEstimate(flops=flops, transcendentals=0,
                                      bytes_accessed=bytes_acc),
    )(xr, xi, sr, si, hr, hi, hs, wtr, wti, wts)
    return jnp.sqrt(part.sum(axis=0))


# ----------------------------------------------------------------------------
# Parameter initialization (deterministic, synthetic)
# ----------------------------------------------------------------------------
_PARAM_KEY = jax.random.PRNGKey(42)
_param_counter = [0]


def _init(shape, scale=0.05):
    _param_counter[0] += 1
    k = jax.random.fold_in(_PARAM_KEY, _param_counter[0])
    return scale * jax.random.normal(k, shape, jnp.float32)


def make_conv_block_params(cin, cout):
    return {"w1": _init((cout, cin, 3, 3)), "w2": _init((cout, cout, 3, 3))}


def make_transpose_params(cin, cout):
    # (4, cout, cin): one (cout, cin) matrix per 2x2 output sub-position
    return {"w": _init((4, cout, cin))}


def make_unet_params(in_chans, out_chans, chans, num_pools, final_bias):
    down = [make_conv_block_params(in_chans, chans)]
    ch = chans
    for _ in range(num_pools - 1):
        down.append(make_conv_block_params(ch, ch * 2))
        ch *= 2
    bottleneck = make_conv_block_params(ch, ch * 2)
    up_t, up_c = [], []
    for _ in range(num_pools - 1):
        up_t.append(make_transpose_params(ch * 2, ch))
        up_c.append({"cb": make_conv_block_params(ch * 2, ch),
                     "final_w": None, "final_b": None})
        ch //= 2
    up_t.append(make_transpose_params(ch * 2, ch))
    up_c.append({"cb": make_conv_block_params(ch * 2, ch),
                 "final_w": _init((out_chans, ch, 1, 1)),
                 "final_b": _init((out_chans,)) if final_bias else None})
    return {"down": down, "bottleneck": bottleneck, "up_t": up_t, "up_c": up_c}


def make_params():
    p = {"sens_unet": make_unet_params(2, 2, CFG.sens_chans, CFG.sens_pools,
                                       final_bias=True),
         "enc": {"w": _init((CFG.chans, 2, 5, 5)), "b": _init((CFG.chans,))},
         "dec": {"w": _init((2, CFG.chans, 5, 5)), "b": _init((2,))}}
    cascades = []
    for ind in range(CFG.num_cascades):
        c = {"dc_weight": jnp.ones((), jnp.float32),
             "unet": make_unet_params(CFG.chans, CFG.chans, CFG.unet_chans,
                                      CFG.pools, final_bias=False)}
        if ind in IMAGE_CONV_CASCADES:
            c["oc_w"] = _init((CFG.chans, CFG.chans, 5, 5))
        cascades.append(c)
    p["cascades"] = cascades
    return p


# ----------------------------------------------------------------------------
# Model building blocks (glue around the Pallas kernels)
# ----------------------------------------------------------------------------
def conv_block_apply(p, x):
    y, s1, s2 = conv2d_fused(x, p["w1"], None, want_stats=True)
    x = _apply_in_lrelu(y, s1, s2)
    y, s1, s2 = conv2d_fused(x, p["w2"], None, want_stats=True)
    return _apply_in_lrelu(y, s1, s2)


def avg_pool2(x):
    n, c, h, wd = x.shape
    return x.reshape(n, c, h // 2, 2, wd // 2, 2).mean(axis=(3, 5))


def unet_apply(p, x):
    stack = []
    out = x
    for layer in p["down"]:
        out = conv_block_apply(layer, out)
        stack.append(out)
        out = avg_pool2(out)
    out = conv_block_apply(p["bottleneck"], out)
    for tp, up in zip(p["up_t"], p["up_c"]):
        skip = stack.pop()
        out = transpose_block_apply(tp, out)
        dh = skip.shape[-2] - out.shape[-2]
        dw = skip.shape[-1] - out.shape[-1]
        if dh or dw:
            out = jnp.pad(out, ((0, 0), (0, 0), (0, dh), (0, dw)), mode="reflect")
        out = jnp.concatenate([out, skip], axis=1)
        out = conv_block_apply(up["cb"], out)
        if up["final_w"] is not None:
            out = conv2d_fused(out, up["final_w"], up["final_b"])
    return out


def encoder_apply(p, image, means, variances):
    x = (image - means) * lax.rsqrt(variances)
    return conv2d_fused(x, p["w"], p["b"])


def decoder_apply(p, features, means, variances):
    x = conv2d_fused(features, p["w"], p["b"])
    return x * jnp.sqrt(variances) + means


def norm_stats(image):
    n, c, h, wd = image.shape
    if n != 1:
        raise ValueError("Unexpected input dimensions.")
    mean, var = channel_stats4(image)
    return mean.reshape(n, c, 1, 1), var.reshape(n, c, 1, 1)


def _pad_to_mult16(x):
    h, wd = x.shape[-2], x.shape[-1]
    hm = ((h - 1) | 15) + 1
    wm = ((wd - 1) | 15) + 1
    hp = ((hm - h) // 2, hm - h - (hm - h) // 2)
    wp = ((wm - wd) // 2, wm - wd - (wm - wd) // 2)
    return jnp.pad(x, ((0, 0), (0, 0), hp, wp)), (hp, wp, h, wd)


def _unpad16(x, pads):
    hp, wp, h, wd = pads
    return x[..., hp[0]:hp[0] + h, wp[0]:wp[0] + wd]


def norm_unet_apply(p, xr, xi):
    """fastMRI NormUnet on (B, 1, H, W, 2) complex input carried as (re, im)."""
    x = jnp.concatenate([xr, xi], axis=1)                 # complex_to_chan_dim
    b, c, h, wd = x.shape
    l = (c // 2) * h * wd
    mean, var = channel_stats4(x)                         # per (b, 2)
    std = jnp.sqrt(var * (l / (l - 1)))                   # torch .std() unbiased
    mean4 = mean.reshape(b, c, 1, 1)
    std4 = std.reshape(b, c, 1, 1)
    xn = scale_act(x, mean4, 1.0 / std4, act=False)
    xp, pads = _pad_to_mult16(xn)
    out = unet_apply(p, xp)
    out = _unpad16(out, pads)
    out = out * std4 + mean4
    return out[:, 0:1], out[:, 1:2]                       # chan_complex_to_last_dim


def sens_net_apply(p, kre, kim, mask_bool, num_low_frequencies):
    n, c, h, wd = kre.shape
    if CFG.mask_center:
        if num_low_frequencies is None or num_low_frequencies == 0:
            sq = mask_bool[:, 0, 0, :, 0].astype(jnp.int32)
            cent = wd // 2
            left = jnp.argmin(jnp.flip(sq[:, :cent], axis=1), axis=1)
            right = jnp.argmin(sq[:, cent:], axis=1)
            nlf = jnp.maximum(2 * jnp.minimum(left, right), 1)
        else:
            nlf = jnp.full((n,), num_low_frequencies, jnp.int32)
        pad = (wd - nlf + 1) // 2
        cols = jnp.arange(wd)
        keep = ((cols[None, :] >= pad[:, None]) &
                (cols[None, :] < (pad + nlf)[:, None])).astype(jnp.float32)
        keep = keep[:, None, :]                           # (N, 1, W)
    else:
        keep = jnp.ones((n, 1, wd), jnp.float32)
    yr, yi = ifft2c_coils(kre, kim, keep)
    sr, si = norm_unet_apply(p, yr.reshape(n * c, 1, h, wd),
                             yi.reshape(n * c, 1, h, wd))
    sr = sr.reshape(n, c, h, wd)
    si = si.reshape(n, c, h, wd)
    return sens_normalize(sr, si)


def _center_crop_hw(x, ch, cw):
    h, wd = x.shape[-2], x.shape[-1]
    top = (h - ch) // 2
    left = (wd - cw) // 2
    return x[..., top:top + ch, left:left + cw]


def _image_uncrop(image, original):
    if image.shape == original.shape:
        return image
    h, wd = original.shape[-2], original.shape[-1]
    ch, cw = image.shape[-2], image.shape[-1]
    top = (h - ch) // 2 + ((h - ch) % 2)
    left = (wd - cw) // 2 + ((wd - cw) % 2)
    return original.at[..., top:top + ch, left:left + cw].set(image)


def cascade_apply(cp, enc_p, dec_p, fi, use_image_conv):
    sr, si = fi["sens"]
    means, variances = fi["means"], fi["variances"]
    feats = instance_norm(fi["features"])                 # input_norm

    # data-consistency term (single fused kernel over coils, group-parallel)
    est_img = decoder_apply(dec_p, feats, means, variances)
    dcr, dci = dc_chain(est_img[:, 0], est_img[:, 1], sr, si,
                        fi["ref"][0], fi["ref"][1], fi["mask"])
    dc_img = jnp.stack([dcr, dci], axis=1)
    dc = cp["dc_weight"] * encoder_apply(enc_p, dc_img, means, variances)

    # feature-space model with (identity at these sizes) crop/uncrop
    ch, cw = fi["crop_size"]
    cropped = _center_crop_hw(feats, ch, cw)
    model_out = _image_uncrop(unet_apply(cp["unet"], cropped), feats)

    new_features = feats - dc - model_out

    if use_image_conv:
        new_features = instance_norm(new_features)        # output_norm
        y, s1, s2 = conv2d_fused(new_features, cp["oc_w"], None, want_stats=True)
        conv_out = _apply_in_lrelu(y, s1, s2)             # conv5x5 + IN + LReLU
        new_features = new_features + conv_out

    out = dict(fi)
    out["features"] = new_features
    return out


@functools.partial(jax.jit, static_argnames=("num_low_frequencies",))
def feature_varnet_forward(params, masked_kspace, mask, num_low_frequencies=None):
    kre = masked_kspace[..., 0] * CFG.kspace_mult_factor
    kim = masked_kspace[..., 1] * CFG.kspace_mult_factor
    maskf = mask[:, 0, :, :, 0].astype(jnp.float32)       # (N, 1, W)

    # _encode_input
    sr, si = sens_net_apply(params["sens_unet"], kre, kim, mask,
                            num_low_frequencies)
    imr, imi = ifft_reduce(kre, kim, sr, si)
    image = jnp.stack([imr, imi], axis=1)                 # (N, 2, H, W)
    h, wd = image.shape[-2], image.shape[-1]
    crop_size = (min(h, CFG.crop_size[0]), min(wd, CFG.crop_size[1]))
    means, variances = norm_stats(image)
    features = encoder_apply(params["enc"], image, means, variances)

    fi = {"features": features, "sens": (sr, si), "crop_size": crop_size,
          "means": means, "variances": variances, "ref": (kre, kim),
          "mask": maskf}

    for ind, cp in enumerate(params["cascades"]):
        fi = cascade_apply(cp, params["enc"], params["dec"], fi,
                           use_image_conv=(ind in IMAGE_CONV_CASCADES))

    # _decode_output + final rss(|ifft2c(.)|) in one fused kernel
    feats = instance_norm(fi["features"])                 # decode_norm
    img = decoder_apply(params["dec"], feats, fi["means"], fi["variances"])
    inv = 1.0 / CFG.kspace_mult_factor                    # linear: fold before expand
    out = decode_rss(img[:, 0] * inv, img[:, 1] * inv, sr, si)
    # TODO(synk): original hard-crops to 384x384; clamped here for small demo inputs.
    ch, cw = min(384, out.shape[-2]), min(384, out.shape[-1])
    return _center_crop_hw(out, ch, cw)


# ----------------------------------------------------------------------------
# Demo
# ----------------------------------------------------------------------------
if __name__ == "__main__":
    # 1) Self-test of the row-tiled deep-K conv kernel (forces 2 row tiles so
    #    the halo staging + tile reassembly path is actually exercised).
    xt = jax.random.normal(jax.random.PRNGKey(1), (1, 4, 16, 16), jnp.float32)
    wtst = 0.1 * jax.random.normal(jax.random.PRNGKey(2), (6, 4, 3, 3),
                                   jnp.float32)
    yk = conv2d_fused(xt, wtst, None, h_tile=8)
    yref = lax.conv_general_dilated(xt, wtst, (1, 1), "SAME",
                                    dimension_numbers=("NCHW", "OIHW", "NCHW"))
    rel = float(jnp.max(jnp.abs(yk - yref)) / (jnp.max(jnp.abs(yref)) + 1e-6))
    assert rel < 3e-2, f"tiled conv self-test mismatch: rel={rel}"

    # 2) End-to-end FeatureVarNet_sh_w forward.
    N, C, H, W = 1, 4, 16, 16                             # NormStats requires N == 1
    key = jax.random.PRNGKey(0)
    kspace = jax.random.normal(key, (N, C, H, W, 2), jnp.float32)

    cols = jnp.arange(W)
    mask_1d = (cols % 2 == 0) | ((cols >= 6) & (cols < 10))
    mask = mask_1d.reshape(1, 1, 1, W, 1)                 # bool, fastMRI convention
    masked_kspace = kspace * mask.astype(jnp.float32)

    params = make_params()
    out = feature_varnet_forward(params, masked_kspace, mask,
                                 num_low_frequencies=4)
    out = jax.block_until_ready(out)
    assert out.shape == (N, min(384, H), min(384, W))
    assert bool(jnp.all(jnp.isfinite(out)))
    print("KERNEL_OK")
</pallas_src>

<mosaic_0001>
module attributes {stable_mosaic.version = 11 : i64} {
  func.func @_conv_kernel(%arg0: i32, %arg1: i32, %arg2: memref<6x36xbf16, #tpu.memory_space<vmem>>, %arg3: memref<6x1xf32, #tpu.memory_space<vmem>>, %arg4: memref<1x144xf32, #tpu.memory_space<vmem>>, %arg5: memref<1x1x4x198xf32, #tpu.memory_space<vmem>>, %arg6: memref<1x1x6x144xf32, #tpu.memory_space<vmem>>, %arg7: memref<1x1x6x1xf32, #tpu.memory_space<vmem>>, %arg8: memref<1x1x6x1xf32, #tpu.memory_space<vmem>>, %arg9: memref<36x144xbf16, #tpu.memory_space<vmem>>) attributes {dimension_semantics = [#tpu.dimension_semantics<parallel>, #tpu.dimension_semantics<parallel>], iteration_bounds = array<i64: 1, 2>, scalar_prefetch = 0 : i64, scratch_operands = 1 : i64, tpu.core_type = #tpu.core_type<tc>, window_params = [{pipeline_mode = #tpu.pipeline_mode<synchronous>, transform_indices = @transform_0, window_bounds = array<i64: 6, 36>}, {pipeline_mode = #tpu.pipeline_mode<synchronous>, transform_indices = @transform_1, window_bounds = array<i64: 6, 1>}, {pipeline_mode = #tpu.pipeline_mode<synchronous>, transform_indices = @transform_2, window_bounds = array<i64: 1, 144>}, {transform_indices = @transform_3, window_bounds = array<i64: 1, 1, 4, 198>}, {transform_indices = @transform_4, window_bounds = array<i64: 1, 1, 6, 144>}, {transform_indices = @transform_5, window_bounds = array<i64: 1, 1, 6, 1>}, {transform_indices = @transform_6, window_bounds = array<i64: 1, 1, 6, 1>}]} {
    %c0 = arith.constant 0 : index
    %c0_0 = arith.constant 0 : index
    %c0_1 = arith.constant 0 : index
    %c0_2 = arith.constant 0 : index
    %0 = vector.load %arg5[%c0, %c0_0, %c0_1, %c0_2] : memref<1x1x4x198xf32, #tpu.memory_space<vmem>>, vector<1x1x4x144xf32>
    %1 = vector.shape_cast %0 : vector<1x1x4x144xf32> to vector<4x144xf32>
    %2 = arith.truncf %1 : vector<4x144xf32> to vector<4x144xbf16>
    %c0_3 = arith.constant 0 : index
    %c0_4 = arith.constant 0 : index
    %3 = vector.load %arg9[%c0_3, %c0_4] : memref<36x144xbf16, #tpu.memory_space<vmem>>, vector<4x144xbf16>
    tpu.vector_store %arg9[%c0_3, %c0_4], %2 {strides = array<i32>} : memref<36x144xbf16, #tpu.memory_space<vmem>>, vector<4x144xbf16>,
    %c0_5 = arith.constant 0 : index
    %c0_6 = arith.constant 0 : index
    %c0_7 = arith.constant 0 : index
    %c1 = arith.constant 1 : index
    %4 = vector.load %arg5[%c0_5, %c0_6, %c0_7, %c1] : memref<1x1x4x198xf32, #tpu.memory_space<vmem>>, vector<1x1x4x144xf32>
    %5 = vector.shape_cast %4 : vector<1x1x4x144xf32> to vector<4x144xf32>
    %6 = arith.truncf %5 : vector<4x144xf32> to vector<4x144xbf16>
    %c4 = arith.constant 4 : index
    %c0_8 = arith.constant 0 : index
    %7 = vector.load %arg9[%c4, %c0_8] : memref<36x144xbf16, #tpu.memory_space<vmem>>, vector<4x144xbf16>
    tpu.vector_store %arg9[%c4, %c0_8], %6 {strides = array<i32>} : memref<36x144xbf16, #tpu.memory_space<vmem>>, vector<4x144xbf16>,
    %c0_9 = arith.constant 0 : index
    %c0_10 = arith.constant 0 : index
    %c0_11 = arith.constant 0 : index
    %c2 = arith.constant 2 : index
    %8 = vector.load %arg5[%c0_9, %c0_10, %c0_11, %c2] : memref<1x1x4x198xf32, #tpu.memory_space<vmem>>, vector<1x1x4x144xf32>
    %9 = vector.shape_cast %8 : vector<1x1x4x144xf32> to vector<4x144xf32>
    %10 = arith.truncf %9 : vector<4x144xf32> to vector<4x144xbf16>
    %c8 = arith.constant 8 : index
    %c0_12 = arith.constant 0 : index
    %11 = vector.load %arg9[%c8, %c0_12] : memref<36x144xbf16, #tpu.memory_space<vmem>>, vector<4x144xbf16>
    tpu.vector_store %arg9[%c8, %c0_12], %10 {strides = array<i32>} : memref<36x144xbf16, #tpu.memory_space<vmem>>, vector<4x144xbf16>,
    %c0_13 = arith.constant 0 : index
    %c0_14 = arith.constant 0 : index
    %c0_15 = arith.constant 0 : index
    %c18 = arith.constant 18 : index
    %12 = vector.load %arg5[%c0_13, %c0_14, %c0_15, %c18] : memref<1x1x4x198xf32, #tpu.memory_space<vmem>>, vector<1x1x4x144xf32>
    %13 = vector.shape_cast %12 : vector<1x1x4x144xf32> to vector<4x144xf32>
    %14 = arith.truncf %13 : vector<4x144xf32> to vector<4x144xbf16>
    %c12 = arith.constant 12 : index
    %c0_16 = arith.constant 0 : index
    %15 = vector.load %arg9[%c12, %c0_16] : memref<36x144xbf16, #tpu.memory_space<vmem>>, vector<4x144xbf16>
    tpu.vector_store %arg9[%c12, %c0_16], %14 {strides = array<i32>} : memref<36x144xbf16, #tpu.memory_space<vmem>>, vector<4x144xbf16>,
    %c0_17 = arith.constant 0 : index
    %c0_18 = arith.constant 0 : index
    %c0_19 = arith.constant 0 : index
    %c19 = arith.constant 19 : index
    %16 = vector.load %arg5[%c0_17, %c0_18, %c0_19, %c19] : memref<1x1x4x198xf32, #tpu.memory_space<vmem>>, vector<1x1x4x144xf32>
    %17 = vector.shape_cast %16 : vector<1x1x4x144xf32> to vector<4x144xf32>
    %18 = arith.truncf %17 : vector<4x144xf32> to vector<4x144xbf16>
    %c16 = arith.constant 16 : index
    %c0_20 = arith.constant 0 : index
    %19 = vector.load %arg9[%c16, %c0_20] : memref<36x144xbf16, #tpu.memory_space<vmem>>, vector<4x144xbf16>
    tpu.vector_store %arg9[%c16, %c0_20], %18 {strides = array<i32>} : memref<36x144xbf16, #tpu.memory_space<vmem>>, vector<4x144xbf16>,
    %c0_21 = arith.constant 0 : index
    %c0_22 = arith.constant 0 : index
    %c0_23 = arith.constant 0 : index
    %c20 = arith.constant 20 : index
    %20 = vector.load %arg5[%c0_21, %c0_22, %c0_23, %c20] : memref<1x1x4x198xf32, #tpu.memory_space<vmem>>, vector<1x1x4x144xf32>
    %21 = vector.shape_cast %20 : vector<1x1x4x144xf32> to vector<4x144xf32>
    %22 = arith.truncf %21 : vector<4x144xf32> to vector<4x144xbf16>
    %c20_24 = arith.constant 20 : index
    %c0_25 = arith.constant 0 : index
    %23 = vector.load %arg9[%c20_24, %c0_25] : memref<36x144xbf16, #tpu.memory_space<vmem>>, vector<4x144xbf16>
    tpu.vector_store %arg9[%c20_24, %c0_25], %22 {strides = array<i32>} : memref<36x144xbf16, #tpu.memory_space<vmem>>, vector<4x144xbf16>,
    %c0_26 = arith.constant 0 : index
    %c0_27 = arith.constant 0 : index
    %c0_28 = arith.constant 0 : index
    %c36 = arith.constant 36 : index
    %24 = vector.load %arg5[%c0_26, %c0_27, %c0_28, %c36] : memref<1x1x4x198xf32, #tpu.memory_space<vmem>>, vector<1x1x4x144xf32>
    %25 = vector.shape_cast %24 : vector<1x1x4x144xf32> to vector<4x144xf32>
    %26 = arith.truncf %25 : vector<4x144xf32> to vector<4x144xbf16>
    %c24 = arith.constant 24 : index
    %c0_29 = arith.constant 0 : index
    %27 = vector.load %arg9[%c24, %c0_29] : memref<36x144xbf16, #tpu.memory_space<vmem>>, vector<4x144xbf16>
    tpu.vector_store %arg9[%c24, %c0_29], %26 {strides = array<i32>} : memref<36x144xbf16, #tpu.memory_space<vmem>>, vector<4x144xbf16>,
    %c0_30 = arith.constant 0 : index
    %c0_31 = arith.constant 0 : index
    %c0_32 = arith.constant 0 : index
    %c37 = arith.constant 37 : index
    %28 = vector.load %arg5[%c0_30, %c0_31, %c0_32, %c37] : memref<1x1x4x198xf32, #tpu.memory_space<vmem>>, vector<1x1x4x144xf32>
    %29 = vector.shape_cast %28 : vector<1x1x4x144xf32> to vector<4x144xf32>
    %30 = arith.truncf %29 : vector<4x144xf32> to vector<4x144xbf16>
    %c28 = arith.constant 28 : index
    %c0_33 = arith.constant 0 : index
    %31 = vector.load %arg9[%c28, %c0_33] : memref<36x144xbf16, #tpu.memory_space<vmem>>, vector<4x144xbf16>
    tpu.vector_store %arg9[%c28, %c0_33], %30 {strides = array<i32>} : memref<36x144xbf16, #tpu.memory_space<vmem>>, vector<4x144xbf16>,
    %c0_34 = arith.constant 0 : index
    %c0_35 = arith.constant 0 : index
    %c0_36 = arith.constant 0 : index
    %c38 = arith.constant 38 : index
    %32 = vector.load %arg5[%c0_34, %c0_35, %c0_36, %c38] : memref<1x1x4x198xf32, #tpu.memory_space<vmem>>, vector<1x1x4x144xf32>
    %33 = vector.shape_cast %32 : vector<1x1x4x144xf32> to vector<4x144xf32>
    %34 = arith.truncf %33 : vector<4x144xf32> to vector<4x144xbf16>
    %c32 = arith.constant 32 : index
    %c0_37 = arith.constant 0 : index
    %35 = vector.load %arg9[%c32, %c0_37] : memref<36x144xbf16, #tpu.memory_space<vmem>>, vector<4x144xbf16>
    tpu.vector_store %arg9[%c32, %c0_37], %34 {strides = array<i32>} : memref<36x144xbf16, #tpu.memory_space<vmem>>, vector<4x144xbf16>,
    %c0_38 = arith.constant 0 : index
    %c0_39 = arith.constant 0 : index
    %36 = vector.load %arg2[%c0_38, %c0_39] : memref<6x36xbf16, #tpu.memory_space<vmem>>, vector<6x36xbf16>
    %c0_40 = arith.constant 0 : index
    %c0_41 = arith.constant 0 : index
    %37 = vector.load %arg9[%c0_40, %c0_41] : memref<36x144xbf16, #tpu.memory_space<vmem>>, vector<36x144xbf16>
    %cst = arith.constant dense<0.000000e+00> : vector<6x144xf32>
    %38 = tpu.matmul %36, %37, %cst {dimension_numbers = #tpu.dot_dimension_numbers<[1], [0], [0], [1], [0, 0, 1, 1], [], []>} : vector<6x36xbf16>, vector<36x144xbf16>, vector<6x144xf32> -> vector<6x144xf32>
    %c0_42 = arith.constant 0 : index
    %c0_43 = arith.constant 0 : index
    %39 = vector.load %arg3[%c0_42, %c0_43] : memref<6x1xf32, #tpu.memory_space<vmem>>, vector<6x1xf32>
    %40 = vector.broadcast %39 : vector<6x1xf32> to vector<6x144xf32>
    %41 = arith.addf %38, %40 : vector<6x144xf32>
    %c0_44 = arith.constant 0 : index
    %c0_45 = arith.constant 0 : index
    %c0_46 = arith.constant 0 : index
    %c0_47 = arith.constant 0 : index
    %42 = vector.load %arg6[%c0_44, %c0_45, %c0_46, %c0_47] : memref<1x1x6x144xf32, #tpu.memory_space<vmem>>, vector<1x1x6x144xf32>
    %43 = vector.shape_cast %42 : vector<1x1x6x144xf32> to vector<6x144xf32>
    %44 = vector.shape_cast %41 : vector<6x144xf32> to vector<1x1x6x144xf32>
    tpu.vector_store %arg6[%c0_44, %c0_45, %c0_46, %c0_47], %44 {strides = array<i32>} : memref<1x1x6x144xf32, #tpu.memory_space<vmem>>, vector<1x1x6x144xf32>,
    %cst_48 = arith.constant 0.000000e+00 : f32
    %45 = vector.broadcast %cst_48 : f32 to vector<6x1xf32>
    %c0_49 = arith.constant 0 : index
    %c0_50 = arith.constant 0 : index
    %c0_51 = arith.constant 0 : index
    %c0_52 = arith.constant 0 : index
    %46 = vector.load %arg7[%c0_49, %c0_50, %c0_51, %c0_52] : memref<1x1x6x1xf32, #tpu.memory_space<vmem>>, vector<1x1x6x1xf32>
    %47 = vector.shape_cast %46 : vector<1x1x6x1xf32> to vector<6x1xf32>
    %48 = vector.shape_cast %45 : vector<6x1xf32> to vector<1x1x6x1xf32>
    tpu.vector_store %arg7[%c0_49, %c0_50, %c0_51, %c0_52], %48 {strides = array<i32>} : memref<1x1x6x1xf32, #tpu.memory_space<vmem>>, vector<1x1x6x1xf32>,
    %cst_53 = arith.constant 0.000000e+00 : f32
    %49 = vector.broadcast %cst_53 : f32 to vector<6x1xf32>
    %c0_54 = arith.constant 0 : index
    %c0_55 = arith.constant 0 : index
    %c0_56 = arith.constant 0 : index
    %c0_57 = arith.constant 0 : index
    %50 = vector.load %arg8[%c0_54, %c0_55, %c0_56, %c0_57] : memref<1x1x6x1xf32, #tpu.memory_space<vmem>>, vector<1x1x6x1xf32>
    %51 = vector.shape_cast %50 : vector<1x1x6x1xf32> to vector<6x1xf32>
    %52 = vector.shape_cast %49 : vector<6x1xf32> to vector<1x1x6x1xf32>
    tpu.vector_store %arg8[%c0_54, %c0_55, %c0_56, %c0_57], %52 {strides = array<i32>} : memref<1x1x6x1xf32, #tpu.memory_space<vmem>>, vector<1x1x6x1xf32>,
    return
  }
  func.func @transform_0(%arg0: i32, %arg1: i32) -> (i32, i32) {
    %c0_i32 = arith.constant 0 : i32
    %c0_i32_0 = arith.constant 0 : i32
    %c0_i32_1 = arith.constant 0 : i32
    return %c0_i32, %c0_i32_0 : i32, i32
  }
  func.func @transform_1(%arg0: i32, %arg1: i32) -> (i32, i32) {
    %c0_i32 = arith.constant 0 : i32
    %c0_i32_0 = arith.constant 0 : i32
    %c0_i32_1 = arith.constant 0 : i32
    return %c0_i32, %c0_i32_0 : i32, i32
  }
  func.func @transform_2(%arg0: i32, %arg1: i32) -> (i32, i32) {
    %c0_i32 = arith.constant 0 : i32
    %c0_i32_0 = arith.constant 0 : i32
    %c0_i32_1 = arith.constant 0 : i32
    return %c0_i32, %c0_i32_0 : i32, i32
  }
  func.func @transform_3(%arg0: i32, %arg1: i32) -> (i32, i32, i32, i32) {
    %c0_i32 = arith.constant 0 : i32
    %c0_i32_0 = arith.constant 0 : i32
    %c0_i32_1 = arith.constant 0 : i32
    return %arg0, %arg1, %c0_i32, %c0_i32_0 : i32, i32, i32, i32
  }
  func.func @transform_4(%arg0: i32, %arg1: i32) -> (i32, i32, i32, i32) {
    %c0_i32 = arith.constant 0 : i32
    %c0_i32_0 = arith.constant 0 : i32
    %c0_i32_1 = arith.constant 0 : i32
    return %arg0, %arg1, %c0_i32, %c0_i32_0 : i32, i32, i32, i32
  }
  func.func @transform_5(%arg0: i32, %arg1: i32) -> (i32, i32, i32, i32) {
    %c0_i32 = arith.constant 0 : i32
    %c0_i32_0 = arith.constant 0 : i32
    %c0_i32_1 = arith.constant 0 : i32
    return %arg0, %arg1, %c0_i32, %c0_i32_0 : i32, i32, i32, i32
  }
  func.func @transform_6(%arg0: i32, %arg1: i32) -> (i32, i32, i32, i32) {
    %c0_i32 = arith.constant 0 : i32
    %c0_i32_0 = arith.constant 0 : i32
    %c0_i32_1 = arith.constant 0 : i32
    return %arg0, %arg1, %c0_i32, %c0_i32_0 : i32, i32, i32, i32
  }
}

</mosaic_0001>

<bundles_post_ra>
// kernel: tpu_custom_call.1
= control target key start
LH: loop header
LB: loop body
LE: loop exit
PB: predicated region body
PF: predicated region fallthrough
CT: control target
= control target key end

     0   :  { %12 = vsyncpa [#allocation4], 0  ;;  %s1700_s0 = inlined_call_operand.hbm [shape: bf16[6,36], index: 0, kind: input, shape index: {}]   ;;  %s1701_s1 = inlined_call_operand.hbm [shape: f32[6,1], index: 1, kind: input, shape index: {}]   ;;  %s1702_s2 = inlined_call_operand.hbm [shape: f32[1,144], index: 2, kind: input, shape index: {}]   ;;  %s1703_s3 = inlined_call_operand.hbm [shape: f32[1,2,4,198], index: 3, kind: input, shape index: {}]   ;;  %s1704_s4 = inlined_call_operand.hbm [shape: f32[1,2,6,144], index: 4, kind: output, shape index: {0}]   ;;  %s1705_s5 = inlined_call_operand.hbm [shape: f32[1,2,6,1], index: 5, kind: output, shape index: {1}]   ;;  %s1706_s6 = inlined_call_operand.hbm [shape: f32[1,2,6,1], index: 6, kind: output, shape index: {2}]  }
   0x1   :  { %13 = vsyncpa [#allocation7], 0 }
   0x2   :  { %14 = vsyncpa [#allocation10], 0 }
   0x3   :  { %16 = vsyncpa [#allocation10 + $0x1], 0 }
   0x4   :  { %17 = vsyncpa [#allocation5], 0 }
   0x5   :  { %19 = vsyncpa [#allocation5 + $0x1], 0 }
   0x6   :  { %20 = vsyncpa [#allocation13], 0 }
   0x7   :  { %22 = vsyncpa [#allocation13 + $0x1], 0  ;;  %s1341_s21 = smov 0   ;;  %s1343_s22 = smov 0  }
   0x8   :  { %s1345_s23 = smov 0   ;;  %s1347_s24 = smov 0  }
   0x9   :  { %s1349_s25 = smov 0   ;;  %s1351_s26 = smov 0  }
   0xa LB: > { %s1372_s27 = sadd.s32 4294967295, %s1287_s26   ;;  %s1710_s28 = sadd.s32 4294967294, %s1287_s26   ;;  %s1287_s26 = sphi %s1351_s26, %s28_s26   ;;  %s1283_s25 = sphi %s1349_s25, %s1736_s25   ;;  %s1279_s24 = sphi %s1347_s24, %s1735_s24   ;;  %s1275_s23 = sphi %s1345_s23, %s1734_s23   ;;  %s1271_s22 = sphi %s1343_s22, %s1733_s22   ;;  %s1267_s21 = sphi %s1341_s21, %s1732_s21  }
   0xb   : > { %p125_p0 = scmp.ne.s32.totalorder %s1271_s22, %s1267_s21  ;;  %p1707_p1 = scmp.eq.s32.totalorder %s1372_s27, 0 }
   0xc   : > { %p157_p3 = scmp.eq.s32.totalorder %s1710_s28, 1  ;;  %p847_p5 = scmp.ge.s32.totalorder %s1287_s26, 1 }
   0xd   : > { %p1383_p4 = por %p1707_p1, %p125_p0  ;;  %p220_p7 = scmp.lt.s32.totalorder %s1287_s26, 3 }
   0xe   : > { %p1388_p6 = por %p157_p3, %p125_p0  ;;  %s1289_s8 = smov [#allocation6]  }
   0xf   : > { %s1711_s29 = scalar_select %p1383_p4, 1, 0 }
  0x10   : > { %s1712_s30 = scalar_select %p1388_p6, 1, 0 }
  0x11   : > { %p1393_p8 = pnand %p847_p5, %p220_p7  ;;  %s244_s9 = sshll.u32 %s1289_s8, 4  ;;  %s245_s9 = int_to_ptr.vmem [resolvable:$true] %s244_s9 }
  0x12   : > { %s1290_s11 = smov [#allocation3]   ;;  %s1291_s13 = smov [#allocation8]  }
  0x13   : > { %s1713_s7 = scalar_select %p1393_p8, 1, 0 }
  0x14   : > { %p920_p10 = pneg %p1393_p8  ;;  %s233_s12 = sshll.u32 %s1290_s11, 4  ;;  %s1406_s12 = int_to_ptr.vmem [resolvable:$true] %s233_s12 }
  0x15   : > { %s1408_s14 = sshll.u32 %s1291_s13, 4  ;;  %s1023_s17 = scalar_lea.hbm %s1701_s1, 128  ;;  %s256_s14 = int_to_ptr.vmem [resolvable:$true] %s1408_s14 }
  0x16   : > { %p1402_p11 = pnand %p920_p10, %p1707_p1  ;;  %p1024_p12 = scmp.ne.s32.totalorder %s1701_s1, %s1023_s17 }
  0x17   : > { %p1030_p5 = scmp.lt.u32.totalorder %s1023_s17, %s1701_s1 }
  0x18   : > { %p1418_p13 = pneg %p1402_p11 }
  0x1a   : > { %p1026_p0 = pnand %p1418_p13, %p1024_p12 }
  0x1c   : > { %p1027_p3 = pneg %p1026_p0 }
  0x1e   : > { %p1032_p7 = pnand %p1030_p5, %p1027_p3 }
  0x20   : > { %1035 = shalt.err (!%p1032_p7)
}
  0x21   : > { %s1036_s13 = scalar_lea.vmem %s245_s9, 128  ;;  %p1044_p2 = scmp.lt.s32.totalorder %s245_s9, %s245_s9 }
  0x22   : > { %p1037_p10 = scmp.ne.s32.totalorder %s245_s9, %s1036_s13  ;;  %p1045_p6 = scmp.lt.s32.totalorder %s1036_s13, %s1036_s13 }
  0x24   : > { %p1039_p9 = pnand %p1037_p10, %p1418_p13  ;;  %p1046_p4 = por %p1045_p6, %p1044_p2 }
  0x26   : > { %p1040_p1 = pneg %p1039_p9 }
  0x28   : > { %p1047_p8 = pnand %p1046_p4, %p1040_p1 }
  0x2a   : > { %1050 = shalt.err (!%p1047_p8)
}
  0x2b   : > { %926 = dma.hbm_to_vmem [thread:$0]  (!%p1402_p11), %s1701_s1, 128, %s245_s9, [#allocation7]  }
  0x2c   : > { %s1051_s19 = scalar_lea.hbm %s1700_s0, 64 }
  0x2d   : > { %p1052_p9 = scmp.ne.s32.totalorder %s1700_s0, %s1051_s19  ;;  %p1058_p1 = scmp.lt.u32.totalorder %s1051_s19, %s1700_s0 }
  0x2f   : > { %p1054_p12 = pnand %p1052_p9, %p1418_p13 }
  0x31   : > { %p1055_p2 = pneg %p1054_p12 }
  0x33   : > { %p1060_p4 = pnand %p1058_p1, %p1055_p2 }
  0x35   : > { %1063 = shalt.err (!%p1060_p4)
}
  0x36   : > { %s1064_s9 = scalar_lea.vmem %s1406_s12, 64  ;;  %p1072_p3 = scmp.lt.s32.totalorder %s1406_s12, %s1406_s12 }
  0x37   : > { %p1065_p6 = scmp.ne.s32.totalorder %s1406_s12, %s1064_s9  ;;  %p1073_p5 = scmp.lt.s32.totalorder %s1064_s9, %s1064_s9 }
  0x39   : > { %p1067_p8 = pnand %p1065_p6, %p1418_p13  ;;  %p1074_p7 = por %p1073_p5, %p1072_p3 }
  0x3b   : > { %p1068_p0 = pneg %p1067_p8 }
  0x3d   : > { %p1075_p10 = pnand %p1074_p7, %p1068_p0 }
  0x3f   : > { %1078 = shalt.err (!%p1075_p10)
}
  0x40   : > { %923 = dma.hbm_to_vmem [thread:$0]  (!%p1402_p11), %s1700_s0, 64, %s1406_s12, [#allocation4]  }
  0x41   : > { %s1079_s18 = scalar_lea.hbm %s1702_s2, 32 }
  0x42   : > { %p1080_p9 = scmp.ne.s32.totalorder %s1702_s2, %s1079_s18  ;;  %p1086_p1 = scmp.lt.u32.totalorder %s1079_s18, %s1702_s2 }
  0x44   : > { %p1082_p12 = pnand %p1080_p9, %p1418_p13 }
  0x46   : > { %p1083_p2 = pneg %p1082_p12 }
  0x48   : > { %p1088_p4 = pnand %p1086_p1, %p1083_p2 }
  0x4a   : > { %1091 = shalt.err (!%p1088_p4)
}
  0x4b   : > { %s1092_s9 = scalar_lea.vmem %s256_s14, 32  ;;  %p1100_p3 = scmp.lt.s32.totalorder %s256_s14, %s256_s14 }
  0x4c   : > { %p1093_p6 = scmp.ne.s32.totalorder %s256_s14, %s1092_s9  ;;  %p1101_p5 = scmp.lt.s32.totalorder %s1092_s9, %s1092_s9 }
  0x4e   : > { %p1095_p8 = pnand %p1093_p6, %p1418_p13  ;;  %p1102_p7 = por %p1101_p5, %p1100_p3 }
  0x50   : > { %p1096_p0 = pneg %p1095_p8 }
  0x52   : > { %p1103_p10 = pnand %p1102_p7, %p1096_p0 }
  0x54   : > { %1106 = shalt.err (!%p1103_p10)
}
  0x55   : > { %929 = dma.hbm_to_vmem [thread:$0]  (!%p1402_p11), %s1702_s2, 32, %s256_s14, [#allocation7]  }
  0x56   : > { %s112_s20 = sadd.s32 1, %s1275_s23  ;;  %s37_s15 = sadd.s32 1, %s1283_s25 }
  0x57   : > { %p119_p13 = scmp.ne.s32.totalorder %s1275_s23, %s1271_s22  ;;  %p38_p9 = scmp.ge.s32.totalorder %s37_s15, 2 }
  0x58   : > { %p120_p12 = scmp.eq.s32.totalorder %s1287_s26, 0  ;;  %p1716_p2 = scmp.eq.s32.totalorder %s1372_s27, 1 }
  0x59   : > { %p947_p4 = scmp.lt.s32.totalorder %s1287_s26, 2  ;;  %s1738_s15 = smov (%p38_p9, %s37_s15), 0 }
  0x5a   : > { %p1483_p1 = por %p1716_p2, %p119_p13  ;;  %p121_p6 = por %p120_p12, %p119_p13 }
  0x5b   : > { %s266_s16 = sand.u32 1, %s1275_s23   ;;  %s108_s17 = ssub.s32 %s1283_s25, %s1738_s15 }
  0x5c   : > { %p110_p8 = scmp.eq.s32.totalorder %s108_s17, 0  ;;  %s852_s14 = sshll.u32 %s266_s16, 3 }
  0x5d   : > { %s889_s18 = sshll.u32 %s1283_s25, 7  ;;  %s270_s9 = scalar_lea.vmem [#allocation9], %s852_s14 }
  0x5e   : > { %s1495_s19 = scalar_select %p110_p8, %s1275_s23, %s112_s20  }
  0x5f   : > { %s1500_s13 = scalar_lea.hbm %s1703_s3, %s889_s18  ;;  %s280_s12 = sshll.u32 %s270_s9, 4  ;;  %s1502_s12 = int_to_ptr.vmem [resolvable:$true] %s280_s12 }
  0x60   : > { %p1506_p11 = pnand %p947_p4, %p121_p6  ;;  %s267_s20 = scalar_lea.sflag [#allocation10], %s266_s16 }
  0x61   : > { %s1107_s17 = scalar_lea.hbm %s1500_s13, 128  ;;  %s1112_s8 = scalar_lea.hbm %s1703_s3, 256 }
  0x62   : > { %p1108_p0 = scmp.ne.s32.totalorder %s1500_s13, %s1107_s17  ;;  %p1109_p3 = pneg %p1506_p11 }
  0x63   : > { %p1113_p10 = scmp.lt.u32.totalorder %s1500_s13, %s1703_s3  ;;  %p1114_p13 = scmp.lt.u32.totalorder %s1112_s8, %s1107_s17 }
  0x64   : > { %p1110_p5 = pnand %p1109_p3, %p1108_p0  ;;  %p1116_p12 = scmp.lt.u32.totalorder %s1107_s17, %s1500_s13 }
  0x65   : > { %p1115_p9 = por %p1114_p13, %p1113_p10 }
  0x66   : > { %p1111_p7 = pneg %p1110_p5 }
  0x67   : > { %p1117_p2 = por %p1116_p12, %p1115_p9 }
  0x69   : > { %p1118_p4 = pnand %p1117_p2, %p1111_p7 }
  0x6b   : > { %1121 = shalt.err (!%p1118_p4)
}
  0x6c   : > { %s1122_s16 = scalar_lea.vmem %s1502_s12, 128  ;;  %s1292_s14 = smov [#allocation9]  }
  0x6d   : > { %p1123_p6 = scmp.ne.s32.totalorder %s1502_s12, %s1122_s16  ;;  %s1127_s18 = sshll.u32 %s1292_s14, 4  ;;  %s1128_s18 = int_to_ptr.vmem [resolvable:$false] %s1127_s18 }
  0x6e   : > { %s1129_s11 = scalar_lea.vmem %s1128_s18, 256  ;;  %p1130_p5 = scmp.lt.s32.totalorder %s1502_s12, %s1128_s18 }
  0x6f   : > { %p1125_p8 = pnand %p1123_p6, %p1109_p3  ;;  %p1131_p10 = scmp.lt.s32.totalorder %s1129_s11, %s1122_s16 }
  0x71   : > { %p1126_p0 = pneg %p1125_p8  ;;  %p1132_p13 = por %p1131_p10, %p1130_p5 }
  0x73   : > { %p1133_p9 = pnand %p1132_p13, %p1126_p0 }
  0x75   : > { %1136 = shalt.err (!%p1133_p9)
}
  0x76   : > { %933 = dma.hbm_to_vmem [thread:$0]  (!%p1506_p11), %s1500_s13, 128, %s1502_s12, %s267_s20  }
  0x77   : > { %p1719_p7 = scmp.ne.s32.totalorder %s1713_s7, 0 }
  0x78   : > { %p1720_p3 = scmp.eq.s32.totalorder (!%p1719_p7), %s1372_s27, 0 }
  0x79   : > { %289 = sbr.rel (%p1719_p7) target bundleno = 516 (0x204), region = 36 }
  0x80   : > { %1246 = dma.done.wait (%p1720_p3), [#allocation4], 64   ;;  %p1721_p12 = pmov %p1720_p3 }
  0x81   : > { %p1722_p2 = pmov %p1720_p3 }
  0x82   : > { %1248 = vsyncadd (%p1721_p12), [#allocation4], 4294967232 }
  0x83   : > { %1250 = dma.done.wait (%p1722_p2), [#allocation7], 160   ;;  %p1723_p4 = pmov %p1722_p2 }
  0x84   : > { %s1546_s28 = sand.u32 1, %s1271_s22   ;;  %p1724_p11 = scmp.ne.s32.totalorder %s1711_s29, 0 }
  0x85   : > { %1252 = vsyncadd (%p1723_p4), [#allocation7], 4294967136  ;;  %s1549_s7 = sshll.u32 %s1546_s28, 3  ;;  %s304_s13 = scalar_lea.sflag [#allocation10], %s1546_s28 }
  0x86   : > { %s307_s12 = scalar_lea.vmem [#allocation9], %s1549_s7 }
  0x87   : > { %1254 = dma.done.wait (%p1724_p11), %s304_s13, 128  }
  0x88   : > { %1256 = vsyncadd (%p1724_p11), %s304_s13, 4294967168  ;;  %v422_v0 = vld [vmem:[%s307_s12] sm:$0xff]  ;;  %vm359_vm0 = vcmask 1041408   ;;  %vm360_vm1 = vcmask 128004   ;;  %s1293_s20 = smov 109   ;;  %s1294_s17 = smov 126  }
  0x89   : > { %v424_v1 = vcombine.high %v422_v0, %v422_v0  ;;  %vm1558_vm2 = vmor %vm360_vm1, %vm359_vm0  ;;  %s1295_s29 = smov 110   ;;  %s1296_s8 = smov 127   ;;  %v1301_v5 = vmov 0   ;;  %v520_v6 = vld [vmem:[#allocation6] sm:$0x3f]  ;;  %vm436_vm3 = vcmask 891904  }
  0x8a   : > { %s1297_s9 = smov 108   ;;  %s1298_s16 = smov 92   ;;  %593 = vmatprep.mubr.bf16.mxu0 %v1301_v5  ;;  %1013 = vset.pattern.permute.xlu0 %v1301_v5  ;;  %vm399_vm4 = vcmask 1031168   ;;  %vm381_vm5 = vcmask 1043458   ;;  %vm382_vm6 = vcmask 130054   ;;  %vm418_vm7 = vcmask 900096  }
  0x8b   : > { %v894_v2 = vpack.c.bf16 %v424_v1, %v422_v0  ;;  %s1299_s14 = smov 91   ;;  %s1300_s18 = smov 90   ;;  %vm378_vm8 = vcmask 1039360   ;;  %vm1568_vm9 = vmor %vm382_vm6, %vm381_vm5  ;;  %vm455_vm10 = vcmask 883712   ;;  %vm473_vm11 = vcmask 752640  }
  0x8c   : > { %vm492_vm12 = vcmask 744448   ;;  %vm510_vm13 = vcmask 736256   ;;  %v514_v40 = vld [vmem:[#allocation3] sm:$0x7]  ;;  %vm551_vm14 = vcmask 293888   ;;  %vm605_vm15 = vcmask 5120  }
  0x8d   : > { %433 = vrot.lane.b32.xlu1 %v894_v2, %s1293_s20  ;;  %396 = vrot.lane.b32.xlu0 %v894_v2, %s1294_s17  ;;  %v414_v4 = vrot.slane %v894_v2, 6  ;;  %362 = vst.msk [vmem:[#allocation2] sm:$0x33] %vm1558_vm2, %v894_v2  ;;  %s613_s11 = sand.u32 1, %s1372_s27   ;;  %s885_s13 = sshll.u32 %s1279_s24, 7  ;;  %v1302_v41 = vmov 0.0  }
  0x8e   : > { %s338_s12 = scalar_lea.vmem [#allocation12], %s1549_s7  ;;  %s1303_s27 = smov [#allocation12]  }
  0x8f   : > { %606 = vst.msk [vmem:[%s338_s12] sm:$0x3f] %vm605_vm15, %v1302_v41 }
  0x91   : > { %415 = vrot.lane.b32.xlu1 %v414_v4, %s1295_s29  ;;  %375 = vrot.lane.b32.xlu0 %v414_v4, %s1296_s8  ;;  %s1595_s29 = scalar_lea.hbm %s1705_s5, %s885_s13  ;;  %s650_s8 = sshll.u32 %s338_s12, 4  ;;  %s651_s8 = int_to_ptr.vmem [resolvable:$true] %s650_s8 }
  0x95   : > { %452 = vrot.lane.b32.xlu0 %v414_v4, %s1297_s9  ;;  %470 = vrot.lane.b32.xlu1 %v894_v2, %s1298_s16  ;;  %s1597_s9 = scalar_lea.sflag [#allocation13], %s613_s11  ;;  %s1137_s16 = scalar_lea.vmem %s651_s8, 128 }
  0x96   : > { %p1138_p6 = scmp.ne.s32.totalorder %s651_s8, %s1137_s16 }
  0x98   : > { %p1139_p8 = pnand %p1138_p6, %p1483_p1 }
  0x99   : > { %489 = vrot.lane.b32.xlu0 %v414_v4, %s1299_s14  ;;  %507 = vrot.lane.b32.xlu1 %v894_v2, %s1300_s18  ;;  %s1141_s14 = sshll.u32 %s1303_s27, 4  ;;  %s1142_s14 = int_to_ptr.vmem [resolvable:$false] %s1141_s14 }
  0x9a   : > { %p1140_p0 = pneg %p1139_p8  ;;  %s1143_s18 = scalar_lea.vmem %s1142_s14, 256 }
  0x9b   : > { %p1144_p5 = scmp.lt.s32.totalorder %s651_s8, %s1142_s14  ;;  %p1145_p10 = scmp.lt.s32.totalorder %s1143_s18, %s1137_s16 }
  0x9d   : > { %523 = vperm.xlu0 %1013, %v520_v6   ;;  %p1146_p13 = por %p1145_p10, %p1144_p5 }
  0x9f   : > { %p1147_p9 = pnand %p1146_p13, %p1140_p0 }
  0xff   : > { %v434_v7 = vpop.permute.xlu1 %433  ;;  %v397_v8 = vpop.permute.xlu0 %396 }
 0x100   : > { %v435_v9 = vrot.slane %v434_v7, 4  ;;  %v398_v10 = vrot.slane %v397_v8, 4 }
 0x102   : > { %v437_v11 = vsel %vm436_vm3, %v434_v7, %v435_v9  ;;  %v400_v12 = vsel %vm399_vm4, %v397_v8, %v398_v10 }
 0x103   : > { %439 = vst.msk [vmem:[#allocation2 + $0x10] sm:$0x33] %vm1558_vm2, %v437_v11  ;;  %402 = vst.msk [vmem:[#allocation2 + $0x8] sm:$0x33] %vm1558_vm2, %v400_v12  ;;  %v416_v13 = vpop.permute.xlu1 %415  ;;  %v376_v14 = vpop.permute.xlu0 %375 }
 0x104   : > { %v417_v16 = vrot.slane %v416_v13, 4  ;;  %v377_v17 = vrot.slane %v376_v14, 4 }
 0x106   : > { %v419_v18 = vsel %vm418_vm7, %v416_v13, %v417_v16  ;;  %v379_v19 = vsel %vm378_vm8, %v376_v14, %v377_v17 }
 0x107   : > { %421 = vst.msk [vmem:[#allocation2 + $0x8] sm:$0xcc] %vm1568_vm9, %v419_v18  ;;  %384 = vst.msk [vmem:[#allocation2] sm:$0xcc] %vm1568_vm9, %v379_v19  ;;  %v453_v20 = vpop.permute.xlu0 %452  ;;  %v471_v21 = vpop.permute.xlu1 %470 }
 0x108   : > { %v454_v22 = vrot.slane %v453_v20, 4  ;;  %v472_v23 = vrot.slane %v471_v21, 4 }
 0x10a   : > { %v456_v24 = vsel %vm455_vm10, %v453_v20, %v454_v22  ;;  %v474_v25 = vsel %vm473_vm11, %v471_v21, %v472_v23 }
 0x10b   : > { %458 = vst.msk [vmem:[#allocation2 + $0x10] sm:$0xcc] %vm1568_vm9, %v456_v24  ;;  %v490_v26 = vpop.permute.xlu0 %489  ;;  %v508_v27 = vpop.permute.xlu1 %507 }
 0x10c   : > { %476 = vst.msk [vmem:[#allocation2 + $0x18] sm:$0x33] %vm1558_vm2, %v474_v25  ;;  %v491_v28 = vrot.slane %v490_v26, 4  ;;  %v509_v29 = vrot.slane %v508_v27, 4 }
 0x10e   : > { %v493_v30 = vsel %vm492_vm12, %v490_v26, %v491_v28  ;;  %v511_v31 = vsel %vm510_vm13, %v508_v27, %v509_v29  ;;  %v1015_v32 = vld [vmem:[#allocation2 + $0x4] ss:$8 sps:$4 sm:$0xff]   ;;  %v1017_v33 = vld [vmem:[#allocation2] ss:$8 sps:$4 sm:$0xff]  }
 0x10f   : > { %495 = vst.msk [vmem:[#allocation2 + $0x18] sm:$0xcc] %vm1568_vm9, %v493_v30  ;;  %561 = vmatprep.subr.bf16.mxu0 %v1015_v32 }
 0x110   : > { %513 = vst.msk [vmem:[#allocation2 + $0x20] sm:$0x33] %vm1558_vm2, %v511_v31  ;;  %562 = vmatpush1.bf16.msra.mxu0 %v1017_v33 }
 0x116   : > { %v1018_v34 = vld [vmem:[#allocation2 + $0x14] ss:$8 sps:$4 sm:$0xff]   ;;  %v1020_v35 = vld [vmem:[#allocation2 + $0x10] ss:$8 sps:$4 sm:$0xff]  }
 0x117   : > { %v519_v36 = vld [vmem:[#allocation2 + $0x20] sm:$0x33]  ;;  %563 = vmatprep.subr.bf16.mxu0 %v1018_v34 }
 0x118   : > { %v877_v37 = vcombine.high %v519_v36, %v519_v36  ;;  %v876_v38 = vcombine.low %v519_v36, %v519_v36  ;;  %564 = vmatpush1.bf16.msra.mxu0 %v1020_v35 }
 0x11a   : > { %878 = vmatprep.subr.msk.bf16.mxu0 %vm359_vm0, %v877_v37  ;;  %v556_v39 = vsel %vm359_vm0, %v876_v38, 0 }
 0x11c   : > { %566 = vmatpush1.bf16.msra.mxu0 %v556_v39 }
 0x11f   : > { %879 = vmatmul.mubr.msk.bf16.vlgmr.msra.gmra.mrb[0].mxu0 %vm551_vm14, %v514_v40 }
 0x120   : > { %1150 = shalt.err (!%p1147_p9)
}
 0x121   : > { %s1151_s11 = scalar_lea.hbm %s1595_s29, 128  ;;  %s1155_s17 = scalar_lea.hbm %s1705_s5, 256 }
 0x122   : > { %p1152_p7 = scmp.ne.s32.totalorder %s1595_s29, %s1151_s11  ;;  %p1156_p2 = scmp.lt.u32.totalorder %s1595_s29, %s1705_s5 }
 0x123   : > { %p1157_p4 = scmp.lt.u32.totalorder %s1155_s17, %s1151_s11  ;;  %p1159_p6 = scmp.lt.u32.totalorder %s1151_s11, %s1595_s29 }
 0x124   : > { %p1153_p3 = pnand %p1152_p7, %p1483_p1 }
 0x125   : > { %p1158_p11 = por %p1157_p4, %p1156_p2 }
 0x126   : > { %p1154_p12 = pneg %p1153_p3 }
 0x127   : > { %p1160_p8 = por %p1159_p6, %p1158_p11 }
 0x129   : > { %p1161_p0 = pnand %p1160_p8, %p1154_p12 }
 0x12b   : > { %1164 = shalt.err (!%p1161_p0)
}
 0x12c   : > { %915 = dma.vmem_to_hbm [thread:$0]  (%p1483_p1), %s651_s8, 128, %s1595_s29, %s1597_s9  }
 0x12d   : > { %s1622_s12 = scalar_lea.hbm %s1706_s6, %s885_s13  ;;  %s345_s20 = scalar_lea.vmem [#allocation14], %s1549_s7 }
 0x12e   : > { %607 = vst.msk [vmem:[%s345_s20] sm:$0x3f] %vm605_vm15, %v1302_v41  ;;  %s665_s11 = sshll.u32 %s345_s20, 4  ;;  %s1304_s27 = smov [#allocation14]   ;;  %s666_s11 = int_to_ptr.vmem [resolvable:$true] %s665_s11 }
 0x12f   : > { %s1165_s17 = scalar_lea.vmem %s666_s11, 128  ;;  %s1169_s14 = sshll.u32 %s1304_s27, 4  ;;  %s1170_s14 = int_to_ptr.vmem [resolvable:$false] %s1169_s14 }
 0x130   : > { %p1166_p5 = scmp.ne.s32.totalorder %s666_s11, %s1165_s17  ;;  %s1171_s29 = scalar_lea.vmem %s1170_s14, 256 }
 0x131   : > { %p1172_p9 = scmp.lt.s32.totalorder %s666_s11, %s1170_s14  ;;  %p1173_p7 = scmp.lt.s32.totalorder %s1171_s29, %s1165_s17 }
 0x132   : > { %p1167_p10 = pnand %p1166_p5, %p1483_p1 }
 0x133   : > { %p1174_p3 = por %p1173_p7, %p1172_p9 }
 0x134   : > { %p1168_p13 = pneg %p1167_p10 }
 0x136   : > { %p1175_p12 = pnand %p1174_p3, %p1168_p13 }
 0x138   : > { %1178 = shalt.err (!%p1175_p12)
}
 0x139   : > { %s1179_s7 = scalar_lea.hbm %s1622_s12, 128  ;;  %s1183_s16 = scalar_lea.hbm %s1706_s6, 256 }
 0x13a   : > { %p1180_p2 = scmp.ne.s32.totalorder %s1622_s12, %s1179_s7  ;;  %p1184_p6 = scmp.lt.u32.totalorder %s1622_s12, %s1706_s6 }
 0x13b   : > { %p1185_p8 = scmp.lt.u32.totalorder %s1183_s16, %s1179_s7  ;;  %p1187_p5 = scmp.lt.u32.totalorder %s1179_s7, %s1622_s12 }
 0x13c   : > { %p1181_p4 = pnand %p1180_p2, %p1483_p1 }
 0x13d   : > { %p1186_p0 = por %p1185_p8, %p1184_p6 }
 0x13e   : > { %p1182_p11 = pneg %p1181_p4 }
 0x13f   : > { %p1188_p10 = por %p1187_p5, %p1186_p0 }
 0x141   : > { %p1189_p13 = pnand %p1188_p10, %p1182_p11 }
 0x143   : > { %1192 = shalt.err (!%p1189_p13)
}
 0x144   : > { %916 = dma.vmem_to_hbm [thread:$0]  (%p1483_p1), %s666_s11, 128, %s1622_s12, %s1597_s9   ;;  %v524_v42 = vpop.permute.xlu0 %523  ;;  %vm603_vm0 = vcmask 128000  }
 0x145   : > { %s860_s17 = sshll.u32 %s1546_s28, 4  ;;  %s899_s27 = sshll.u32 %s1279_s24, 8 }
 0x146   : > { %s331_s14 = scalar_lea.vmem [#allocation11], %s860_s17  ;;  %s1649_s8 = scalar_lea.hbm %s1704_s4, %s899_s27 }
 0x147   : > { %s635_s29 = sshll.u32 %s331_s14, 4  ;;  %s609_s24 = scalar_lea.sflag [#allocation5], %s1546_s28  ;;  %s1651_s29 = int_to_ptr.vmem [resolvable:$true] %s635_s29 }
 0x148   : > { %s1193_s9 = scalar_lea.vmem %s1651_s29, 256  ;;  %s1305_s12 = smov [#allocation11]  }
 0x149   : > { %p1194_p9 = scmp.ne.s32.totalorder %s1651_s29, %s1193_s9  ;;  %s1197_s11 = sshll.u32 %s1305_s12, 4  ;;  %s1198_s11 = int_to_ptr.vmem [resolvable:$false] %s1197_s11 }
 0x14a   : > { %s1199_s16 = scalar_lea.vmem %s1198_s11, 512  ;;  %p1200_p12 = scmp.lt.s32.totalorder %s1651_s29, %s1198_s11 }
 0x14b   : > { %p1195_p7 = pnand %p1194_p9, %p1483_p1  ;;  %p1201_p2 = scmp.lt.s32.totalorder %s1199_s16, %s1193_s9 }
 0x14d   : > { %p1196_p3 = pneg %p1195_p7  ;;  %p1202_p4 = por %p1201_p2, %p1200_p12 }
 0x14f   : > { %p1203_p11 = pnand %p1202_p4, %p1196_p3 }
 0x1f2   : > { %v595_v43 = vpop.f32.mrb[0].mxu0 }
 0x1f3   : > { %v596_v44 = vadd.f32 %v595_v43, %v524_v42  ;;  %v597_v45 = vpop.f32.mrb[1].mxu0 }
 0x1f4   : > { %v598_v46 = vadd.f32 %v597_v45, %v524_v42  ;;  %v599_v47 = vpop.f32.mrb[2].mxu0 }
 0x1f5   : > { %602 = vst [vmem:[%s331_s14] sm:$0x3f] %v596_v44  ;;  %v600_v48 = vpop.f32.mrb[3].mxu0 }
 0x1f6   : > { %604 = vst.msk [vmem:[%s331_s14 + $0x8] sm:$0x3f] %vm603_vm0, %v598_v46 }
 0x1f7   : > { %1206 = shalt.err (!%p1203_p11)
}
 0x1f8   : > { %s1207_s28 = scalar_lea.hbm %s1649_s8, 256  ;;  %s1211_s17 = scalar_lea.hbm %s1704_s4, 512 }
 0x1f9   : > { %p1208_p6 = scmp.ne.s32.totalorder %s1649_s8, %s1207_s28  ;;  %p1212_p5 = scmp.lt.u32.totalorder %s1649_s8, %s1704_s4 }
 0x1fa   : > { %p1213_p10 = scmp.lt.u32.totalorder %s1211_s17, %s1207_s28  ;;  %p1215_p9 = scmp.lt.u32.totalorder %s1207_s28, %s1649_s8 }
 0x1fb   : > { %p1209_p8 = pnand %p1208_p6, %p1483_p1 }
 0x1fc   : > { %p1214_p13 = por %p1213_p10, %p1212_p5 }
 0x1fd   : > { %p1210_p0 = pneg %p1209_p8 }
 0x1fe   : > { %p1216_p7 = por %p1215_p9, %p1214_p13 }
 0x200   : > { %p1217_p3 = pnand %p1216_p7, %p1210_p0 }
 0x202   : > { %1220 = shalt.err (!%p1217_p3)
}
 0x203   : > { %914 = dma.vmem_to_hbm [thread:$0]  (%p1483_p1), %s1651_s29, 256, %s1649_s8, %s609_s24  }
 0x204 PF: > { %s677_s7 = sand.u32 1, %s1267_s21   ;;  %p1729_p12 = scmp.ne.s32.totalorder %s1712_s30, 0 }
 0x205   : > { %p1730_p2 = scmp.ge.s32.totalorder %s1287_s26, 2  ;;  %s678_s13 = scalar_lea.sflag [#allocation5], %s677_s7 }
 0x207   : > { %p935_p4 = pnand %p1730_p2, %p1729_p12 }
 0x209   : > { %1258 = dma.done.wait (!%p935_p4), %s678_s13, 256  }
 0x20a   : > { %1260 = vsyncadd (!%p935_p4), %s678_s13, 4294967040  ;;  %s1731_s9 = sadd.s32 4294967294, %s1287_s26  }
 0x20b   : > { %s686_s12 = sand.u32 1, %s1731_s9  }
 0x20c   : > { %s687_s11 = scalar_lea.sflag [#allocation13], %s686_s12 }
 0x20d   : > { %1262 = dma.done.wait (!%p935_p4), %s687_s11, 256  }
 0x20e   : > { %1264 = vsyncadd (!%p935_p4), %s687_s11, 4294967040  ;;  %s28_s26 = sadd.s32 1, %s1287_s26   ;;  %s1732_s21 = smov %s1271_s22 }
 0x20f   : > { %p25_p1 = scmp.ge.s32.totalorder %s28_s26, 4   ;;  %s1733_s22 = smov %s1275_s23 }
 0x210   : > { %s1734_s23 = smov %s1495_s19  ;;  %s1735_s24 = smov %s1283_s25 }
 0x211   : > { %s1736_s25 = smov %s1738_s15  ;;  %27 = sbr.rel (!%p25_p1) target bundleno = 10 (0xa), region = 126 }
 0x218   :  { %701 = vsyncpa [#allocation4], 1 }
 0x219   :  { %703 = vsyncpa [#allocation4 + $0x1], 1 }
 0x21a   :  { %704 = vsyncpa [#allocation7], 1 }
 0x21b   :  { %705 = vsyncpa [#allocation10], 1 }
 0x21c   :  { %707 = vsyncpa [#allocation10 + $0x1], 1 }
 0x21d   :  { %708 = vsyncpa [#allocation5], 1 }
 0x21e   :  { %710 = vsyncpa [#allocation5 + $0x1], 1 }
 0x21f   :  { %711 = vsyncpa [#allocation13], 1 }
 0x220   :  { %713 = vsyncpa [#allocation13 + $0x1], 1 }

</bundles_post_ra>
